<compile_context>
chip_gen: v5e
topology: v5e:2x2
jax: 0.10.0
libtpu: 0.0.40
codegen_flags: <defaults>
</compile_context>

<pallas_src>
import functools

import jax
import jax.numpy as jnp
from jax.experimental import pallas as pl
from jax.experimental.pallas import tpu as pltpu


_VMEM_SPEC = pl.BlockSpec(memory_space=pltpu.MemorySpace.VMEM)
_NEG_BIG = -1e30  # pins padded class logits; exp() underflows to exactly 0.0


def _round_up(v, m):
    return ((v + m - 1) // m) * m


# ----------------------------- Pallas kernel ------------------------------


def _graphsage_fused_kernel(adj_ref, x_ref, w_root1_ref, w_rel1_ref, b1_ref,
                            w2_ref, b2_ref, o_ref, *, classes, c_pad):
    """Fused 2-layer GraphSAGE forward.

    adj_ref:            [N, N]         bf16  dense adjacency (adj[i,j] = edge j->i)
    x_ref:              [N, Fin]       bf16  node features
    w_root1/w_rel1_ref: [Fin, Hpad]    bf16  layer-1 weights (pre-transposed, padded)
    b1_ref:             [1, Hpad]      f32   (zero in padded hidden columns)
    w2_ref:             [Hpad, 2*Cpad] bf16  [W_root2 | W_rel2] (pre-transposed, padded)
    b2_ref:             [1, Cpad]      f32   (-1e30 in padded class columns)
    o_ref:              [N, classes]   f32   log-probabilities
    """
    adj = adj_ref[...]
    x = x_ref[...]

    # ---- layer 1: h = relu(x @ W_root1 + (adj @ x) @ W_rel1 + b1)
    agg1 = jnp.dot(adj, x, preferred_element_type=jnp.float32)            # [N, Fin]
    h = (jnp.dot(x, w_root1_ref[...], preferred_element_type=jnp.float32)
         + jnp.dot(agg1.astype(jnp.bfloat16), w_rel1_ref[...],
                   preferred_element_type=jnp.float32)
         + b1_ref[...])
    h = jnp.maximum(h, 0.0).astype(jnp.bfloat16)                          # [N, Hpad]

    # ---- layer 2 (re-associated): logits = h @ W_root2 + adj @ (h @ W_rel2) + b2
    proj = jnp.dot(h, w2_ref[...], preferred_element_type=jnp.float32)    # [N, 2*Cpad]
    root = proj[:, :c_pad]
    rel = proj[:, c_pad:]
    agg2 = jnp.dot(adj, rel.astype(jnp.bfloat16),
                   preferred_element_type=jnp.float32)                    # [N, Cpad]
    logits = root + agg2 + b2_ref[...]                                    # [N, Cpad]

    # ---- log_softmax along the (lane-dense, padded) class axis
    m = jnp.max(logits, axis=1, keepdims=True)
    s = logits - m
    lse = jnp.log(jnp.sum(jnp.exp(s), axis=1, keepdims=True))
    o_ref[...] = (s - lse)[:, :classes].astype(o_ref.dtype)


# ------------------------------ JAX wrappers --------------------------------


def prepare_params(params, *, lane=128):
    """One-time transform of PyTorch-layout params into the kernel layout."""
    hidden, feature = params["w_rel1"].shape
    classes = params["w_rel2"].shape[0]
    h_pad = _round_up(hidden, lane)
    c_pad = _round_up(classes, lane)

    def pad_t(w, rows, cols):
        wt = jnp.transpose(w)  # [in, out]
        return (jnp.zeros((rows, cols), jnp.float32)
                .at[:wt.shape[0], :wt.shape[1]].set(wt))

    w_root1 = pad_t(params["w_root1"], feature, h_pad).astype(jnp.bfloat16)
    w_rel1 = pad_t(params["w_rel1"], feature, h_pad).astype(jnp.bfloat16)
    b1 = jnp.zeros((1, h_pad), jnp.float32).at[0, :hidden].set(params["b1"])

    w_root2 = pad_t(params["w_root2"], h_pad, c_pad)
    w_rel2 = pad_t(params["w_rel2"], h_pad, c_pad)
    w2 = jnp.concatenate([w_root2, w_rel2], axis=1).astype(jnp.bfloat16)  # [Hpad, 2*Cpad]
    b2 = jnp.full((1, c_pad), _NEG_BIG, jnp.float32).at[0, :classes].set(params["b2"])

    return {"w_root1": w_root1, "w_rel1": w_rel1, "b1": b1, "w2": w2, "b2": b2}


def graphsage_forward(prepared, x, adj, *, classes):
    """x: [N, Fin] f32, adj: [N, N] f32 dense adjacency. Returns [N, classes] f32."""
    n = x.shape[0]
    c_pad = prepared["b2"].shape[1]
    adj_b = adj.astype(jnp.bfloat16)   # 0/1 edge weights: exact in bf16
    x_b = x.astype(jnp.bfloat16)
    kernel = functools.partial(_graphsage_fused_kernel, classes=classes, c_pad=c_pad)
    return pl.pallas_call(
        kernel,
        out_shape=jax.ShapeDtypeStruct((n, classes), jnp.float32),
        in_specs=[_VMEM_SPEC] * 7,
        out_specs=_VMEM_SPEC,
    )(adj_b, x_b, prepared["w_root1"], prepared["w_rel1"], prepared["b1"],
      prepared["w2"], prepared["b2"])


def graphsage_reference(params, x, adj):
    """Plain-JAX reference with the same bf16-input / f32-accumulate math."""
    bf = jnp.bfloat16
    adj_b = adj.astype(bf)
    x_b = x.astype(bf)
    agg1 = jnp.dot(adj_b, x_b, preferred_element_type=jnp.float32)
    h = (jnp.dot(x_b, params["w_root1"].T.astype(bf), preferred_element_type=jnp.float32)
         + jnp.dot(agg1.astype(bf), params["w_rel1"].T.astype(bf),
                   preferred_element_type=jnp.float32)
         + params["b1"][None, :])
    h = jnp.maximum(h, 0.0).astype(bf)
    root = jnp.dot(h, params["w_root2"].T.astype(bf), preferred_element_type=jnp.float32)
    rel = jnp.dot(h, params["w_rel2"].T.astype(bf), preferred_element_type=jnp.float32)
    agg2 = jnp.dot(adj_b, rel.astype(bf), preferred_element_type=jnp.float32)
    logits = root + agg2 + params["b2"][None, :]
    return jax.nn.log_softmax(logits, axis=1)


# ------------------------------ parameter init ------------------------------


def init_params(key, feature, hidden, classes):
    ks = jax.random.split(key, 6)

    def uniform(k, shape, fan_in):
        bound = 1.0 / jnp.sqrt(float(fan_in))
        return jax.random.uniform(k, shape, jnp.float32, -bound, bound)

    return {
        # GraphConv(feature, hidden): lin_rel [hidden, feature] (+bias), lin_root [hidden, feature]
        "w_rel1": uniform(ks[0], (hidden, feature), feature),
        "w_root1": uniform(ks[1], (hidden, feature), feature),
        "b1": uniform(ks[2], (hidden,), feature),
        # GraphConv(hidden, classes)
        "w_rel2": uniform(ks[3], (classes, hidden), hidden),
        "w_root2": uniform(ks[4], (classes, hidden), hidden),
        "b2": uniform(ks[5], (classes,), hidden),
    }


# ---------------------------------- main -------------------------------------


if __name__ == "__main__":
    N, FEATURE, HIDDEN, CLASSES = 64, 16, 32, 8

    key = jax.random.PRNGKey(0)
    k_x, k_adj, k_params = jax.random.split(key, 3)

    # node features [N, FEATURE]
    x = jax.random.normal(k_x, (N, FEATURE), jnp.float32)

    # random symmetric 0/1 adjacency with self-loops removed -> dense float32
    a = (jax.random.uniform(k_adj, (N, N)) < 0.1).astype(jnp.float32)
    adj = jnp.maximum(a, a.T) * (1.0 - jnp.eye(N, dtype=jnp.float32))

    params = init_params(k_params, FEATURE, HIDDEN, CLASSES)
    prepared = prepare_params(params)  # one-time transpose / concat / pad

    fwd = jax.jit(functools.partial(graphsage_forward, classes=CLASSES))
    out = jax.block_until_ready(fwd(prepared, x, adj))

    assert out.shape == (N, CLASSES)
    # rows of log_softmax must exp-sum to 1
    assert jnp.allclose(jnp.sum(jnp.exp(out), axis=1), 1.0, atol=1e-4)
    # matches a plain-JAX reference using the same mixed-precision math
    ref = graphsage_reference(params, x, adj)
    assert float(jnp.max(jnp.abs(out - ref))) < 5e-2
    print("KERNEL_OK")
</pallas_src>

<mosaic_0001>
module attributes {stable_mosaic.version = 11 : i64} {
  func.func @_graphsage_fused_kernel(%arg0: memref<64x64xbf16, #tpu.memory_space<vmem>>, %arg1: memref<64x16xbf16, #tpu.memory_space<vmem>>, %arg2: memref<16x128xbf16, #tpu.memory_space<vmem>>, %arg3: memref<16x128xbf16, #tpu.memory_space<vmem>>, %arg4: memref<1x128xf32, #tpu.memory_space<vmem>>, %arg5: memref<128x256xbf16, #tpu.memory_space<vmem>>, %arg6: memref<1x128xf32, #tpu.memory_space<vmem>>, %arg7: memref<64x8xf32, #tpu.memory_space<vmem>>) attributes {dimension_semantics = [], scalar_prefetch = 0 : i64, scratch_operands = 0 : i64, tpu.core_type = #tpu.core_type<tc>} {
    %c0 = arith.constant 0 : index
    %c0_0 = arith.constant 0 : index
    %0 = vector.load %arg0[%c0, %c0_0] : memref<64x64xbf16, #tpu.memory_space<vmem>>, vector<64x64xbf16>
    %c0_1 = arith.constant 0 : index
    %c0_2 = arith.constant 0 : index
    %1 = vector.load %arg1[%c0_1, %c0_2] : memref<64x16xbf16, #tpu.memory_space<vmem>>, vector<64x16xbf16>
    %cst = arith.constant dense<0.000000e+00> : vector<64x16xf32>
    %2 = tpu.matmul %0, %1, %cst {dimension_numbers = #tpu.dot_dimension_numbers<[1], [0], [0], [1], [0, 0, 1, 1], [], []>} : vector<64x64xbf16>, vector<64x16xbf16>, vector<64x16xf32> -> vector<64x16xf32>
    %c0_3 = arith.constant 0 : index
    %c0_4 = arith.constant 0 : index
    %3 = vector.load %arg2[%c0_3, %c0_4] : memref<16x128xbf16, #tpu.memory_space<vmem>>, vector<16x128xbf16>
    %cst_5 = arith.constant dense<0.000000e+00> : vector<64x128xf32>
    %4 = tpu.matmul %1, %3, %cst_5 {dimension_numbers = #tpu.dot_dimension_numbers<[1], [0], [0], [1], [0, 0, 1, 1], [], []>} : vector<64x16xbf16>, vector<16x128xbf16>, vector<64x128xf32> -> vector<64x128xf32>
    %5 = arith.truncf %2 : vector<64x16xf32> to vector<64x16xbf16>
    %c0_6 = arith.constant 0 : index
    %c0_7 = arith.constant 0 : index
    %6 = vector.load %arg3[%c0_6, %c0_7] : memref<16x128xbf16, #tpu.memory_space<vmem>>, vector<16x128xbf16>
    %cst_8 = arith.constant dense<0.000000e+00> : vector<64x128xf32>
    %7 = tpu.matmul %5, %6, %cst_8 {dimension_numbers = #tpu.dot_dimension_numbers<[1], [0], [0], [1], [0, 0, 1, 1], [], []>} : vector<64x16xbf16>, vector<16x128xbf16>, vector<64x128xf32> -> vector<64x128xf32>
    %8 = arith.addf %4, %7 : vector<64x128xf32>
    %c0_9 = arith.constant 0 : index
    %c0_10 = arith.constant 0 : index
    %9 = vector.load %arg4[%c0_9, %c0_10] : memref<1x128xf32, #tpu.memory_space<vmem>>, vector<1x128xf32>
    %10 = vector.broadcast %9 : vector<1x128xf32> to vector<64x128xf32>
    %11 = arith.addf %8, %10 : vector<64x128xf32>
    %cst_11 = arith.constant 0.000000e+00 : f32
    %12 = vector.broadcast %cst_11 : f32 to vector<64x128xf32>
    %13 = arith.maximumf %11, %12 : vector<64x128xf32>
    %14 = arith.truncf %13 : vector<64x128xf32> to vector<64x128xbf16>
    %c0_12 = arith.constant 0 : index
    %c0_13 = arith.constant 0 : index
    %15 = vector.load %arg5[%c0_12, %c0_13] : memref<128x256xbf16, #tpu.memory_space<vmem>>, vector<128x256xbf16>
    %cst_14 = arith.constant dense<0.000000e+00> : vector<64x256xf32>
    %16 = tpu.matmul %14, %15, %cst_14 {dimension_numbers = #tpu.dot_dimension_numbers<[1], [0], [0], [1], [0, 0, 1, 1], [], []>} : vector<64x128xbf16>, vector<128x256xbf16>, vector<64x256xf32> -> vector<64x256xf32>
    %17 = vector.extract_strided_slice %16 {offsets = [0, 0], sizes = [64, 128], strides = [1, 1]} : vector<64x256xf32> to vector<64x128xf32>
    %18 = vector.extract_strided_slice %16 {offsets = [0, 128], sizes = [64, 128], strides = [1, 1]} : vector<64x256xf32> to vector<64x128xf32>
    %19 = arith.truncf %18 : vector<64x128xf32> to vector<64x128xbf16>
    %cst_15 = arith.constant dense<0.000000e+00> : vector<64x128xf32>
    %20 = tpu.matmul %0, %19, %cst_15 {dimension_numbers = #tpu.dot_dimension_numbers<[1], [0], [0], [1], [0, 0, 1, 1], [], []>} : vector<64x64xbf16>, vector<64x128xbf16>, vector<64x128xf32> -> vector<64x128xf32>
    %21 = arith.addf %17, %20 : vector<64x128xf32>
    %c0_16 = arith.constant 0 : index
    %c0_17 = arith.constant 0 : index
    %22 = vector.load %arg6[%c0_16, %c0_17] : memref<1x128xf32, #tpu.memory_space<vmem>>, vector<1x128xf32>
    %23 = vector.broadcast %22 : vector<1x128xf32> to vector<64x128xf32>
    %24 = arith.addf %21, %23 : vector<64x128xf32>
    %cst_18 = arith.constant dense<0xFF800000> : vector<64xf32>
    %25 = vector.multi_reduction <maximumf>, %24, %cst_18 [1] : vector<64x128xf32> to vector<64xf32>
    %26 = vector.shape_cast %25 : vector<64xf32> to vector<64x1xf32>
    %27 = vector.broadcast %26 : vector<64x1xf32> to vector<64x128xf32>
    %28 = arith.subf %24, %27 : vector<64x128xf32>
    %29 = math.exp %28 : vector<64x128xf32>
    %cst_19 = arith.constant dense<0.000000e+00> : vector<64xf32>
    %30 = vector.multi_reduction <add>, %29, %cst_19 [1] : vector<64x128xf32> to vector<64xf32>
    %31 = vector.shape_cast %30 : vector<64xf32> to vector<64x1xf32>
    %32 = math.log %31 : vector<64x1xf32>
    %33 = vector.broadcast %32 : vector<64x1xf32> to vector<64x128xf32>
    %34 = arith.subf %28, %33 : vector<64x128xf32>
    %35 = vector.extract_strided_slice %34 {offsets = [0, 0], sizes = [64, 8], strides = [1, 1]} : vector<64x128xf32> to vector<64x8xf32>
    %c0_20 = arith.constant 0 : index
    %c0_21 = arith.constant 0 : index
    %36 = vector.load %arg7[%c0_20, %c0_21] : memref<64x8xf32, #tpu.memory_space<vmem>>, vector<64x8xf32>
    tpu.vector_store %arg7[%c0_20, %c0_21], %35 {strides = array<i32>} : memref<64x8xf32, #tpu.memory_space<vmem>>, vector<64x8xf32>,
    return
  }
}

</mosaic_0001>

<bundles_post_ra>
// kernel: graphsage_forward.1
= control target key start
LH: loop header
LB: loop body
LE: loop exit
PB: predicated region body
PF: predicated region fallthrough
CT: control target
= control target key end

     0   :  { %12 = vsyncpa [#allocation3], 0  ;;  %s784_s27 = smov [#allocation2]   ;;  %s785_s29 = smov 128   ;;  %s930_s0 = inlined_call_operand.vmem [shape: bf16[64,64], index: 0, kind: input, shape index: {}]   ;;  %s931_s1 = inlined_call_operand.vmem [shape: bf16[64,16], index: 1, kind: input, shape index: {}]   ;;  %s932_s2 = inlined_call_operand.vmem [shape: bf16[16,128], index: 2, kind: input, shape index: {}]   ;;  %s933_s3 = inlined_call_operand.vmem [shape: bf16[16,128], index: 3, kind: input, shape index: {}]   ;;  %s934_s4 = inlined_call_operand.vmem [shape: f32[1,128], index: 4, kind: input, shape index: {}]   ;;  %s935_s5 = inlined_call_operand.hbm [shape: bf16[128,256], index: 5, kind: input, shape index: {}]   ;;  %s936_s6 = inlined_call_operand.vmem [shape: f32[1,128], index: 6, kind: input, shape index: {}]   ;;  %s937_s7 = inlined_call_operand.vmem [shape: f32[64,8], index: 7, kind: output, shape index: {}]  }
   0x1   :  { %s27_s26 = sshll.u32 %s935_s5, 4  ;;  %s29_s28 = sshll.u32 %s784_s27, 4  ;;  %s28_s26 = int_to_ptr.hbm [resolvable:$true] %s27_s26  ;;  %s30_s28 = int_to_ptr.vmem [resolvable:$true] %s29_s28 }
   0x2   :  { %s786_s30 = smov 8  }
   0x3   :  { %35 = dma.hbm_to_vmem [thread:$0]  %s28_s26, 2048, %s30_s28, [#allocation3], %s785_s29, %s785_s29, %s786_s30  }
   0x4   :  { %782 = dma.done.wait [#allocation3], 2048  }
   0x5   :  { %783 = vsyncadd [#allocation3], 4294965248  ;;  %v700_v0 = vld [vmem:[%s931_s1 + $0x18] sm:$0xff]  ;;  %v699_v1 = vld [vmem:[%s931_s1 + $0x10] sm:$0xff]  ;;  %vm103_vm0 = vcmask 523264   ;;  %vm159_vm1 = vcmask 130048  }
   0x6   :  { %120 = vmatpush.bf16.msra.mxu0 %v700_v0  ;;  %v698_v2 = vld [vmem:[%s931_s1 + $0x8] sm:$0xff]  ;;  %v697_v3 = vld [vmem:[%s931_s1] sm:$0xff]  ;;  %v867_v8 = vld [vmem:[%s930_s0 + $0x10] sm:$0xff]  ;;  %vm559_vm2 = vcmask 64512  }
   0x7   :  { %v845_v4 = vld [vmem:[%s930_s0] sm:$0xff]  ;;  %v852_v5 = vld [vmem:[%s930_s0 + $0x8] sm:$0xff]  ;;  %v876_v9 = vld [vmem:[%s930_s0 + $0x18] sm:$0xff] }
   0x8   :  { %v702_v6 = vld [vmem:[%s933_s3] sm:$0xff]  ;;  %v683_v16 = vld [vmem:[#allocation2 + $0x70] sm:$0xf]  ;;  %v718_v17 = vld [vmem:[#allocation2 + $0x74] sm:$0xf0] }
   0x9   :  { %v701_v7 = vld [vmem:[%s932_s2] sm:$0xff]  ;;  %719 = vmatpush.bf16.msra.mxu1 %v702_v6  ;;  %v717_v18 = vld [vmem:[#allocation2 + $0x74] sm:$0xf]  ;;  %v684_v19 = vor.u32 %v718_v17, %v683_v16  ;;  %v685_v20 = vld [vmem:[#allocation2 + $0x78] sm:$0xf0] }
   0xa   :  { %121 = vmatpush.bf16.msra.mxu0 %v699_v1  ;;  %226 = vmatpush.bf16.msra.mxu2 %v701_v7  ;;  %v675_v21 = vld [vmem:[#allocation2 + $0x60] sm:$0xf]  ;;  %v716_v22 = vld [vmem:[#allocation2 + $0x64] sm:$0xf0]  ;;  %v688_v23 = vor.u32 %v717_v18, %v685_v20  ;;  %v715_v24 = vld [vmem:[#allocation2 + $0x64] sm:$0xf] }
   0xb   :  { %720 = vmatpush.bf16.msra.mxu3 %v701_v7  ;;  %v677_v25 = vld [vmem:[#allocation2 + $0x68] sm:$0xf0]  ;;  %v676_v26 = vor.u32 %v716_v22, %v675_v21  ;;  %v667_v28 = vld [vmem:[#allocation2 + $0x50] sm:$0xf]  ;;  %v714_v29 = vld [vmem:[#allocation2 + $0x54] sm:$0xf0] }
   0xc   :  { %v680_v27 = vor.u32 %v715_v24, %v677_v25  ;;  %v713_v31 = vld [vmem:[#allocation2 + $0x54] sm:$0xf]  ;;  %v669_v32 = vld [vmem:[#allocation2 + $0x58] sm:$0xf0]  ;;  %v668_v33 = vor.u32 %v714_v29, %v667_v28  ;;  %v659_v35 = vld [vmem:[#allocation2 + $0x40] sm:$0xf] }
   0xd   :  { %621 = vmatmul.msk.bf16.vlgmr.msra.gmra.mxu2 %vm159_vm1, %v697_v3  ;;  %397 = vmatpush.bf16.msrb.mxu1 %v688_v23  ;;  %v672_v34 = vor.u32 %v713_v31, %v669_v32  ;;  %v712_v36 = vld [vmem:[#allocation2 + $0x44] sm:$0xf0]  ;;  %v711_v37 = vld [vmem:[#allocation2 + $0x44] sm:$0xf]  ;;  %v661_v38 = vld [vmem:[#allocation2 + $0x48] sm:$0xf0] }
   0xe   :  { %122 = vmatpush.bf16.msra.mxu0 %v698_v2  ;;  %623 = vmatmul.msk.bf16.vlgmr.msra.gmra.mxu3 %vm159_vm1, %v699_v1  ;;  %v660_v39 = vor.u32 %v712_v36, %v659_v35  ;;  %v664_v41 = vor.u32 %v711_v37, %v661_v38  ;;  %v651_v46 = vld [vmem:[#allocation2 + $0x30] sm:$0xf]  ;;  %v710_v47 = vld [vmem:[#allocation2 + $0x34] sm:$0xf0]  ;;  %v709_v48 = vld [vmem:[#allocation2 + $0x34] sm:$0xf] }
   0xf   :  { %368 = vmatpush.bf16.msrb.mxu3 %v684_v19  ;;  %v652_v49 = vor.u32 %v710_v47, %v651_v46  ;;  %v653_v50 = vld [vmem:[#allocation2 + $0x38] sm:$0xf0]  ;;  %v643_v52 = vld [vmem:[#allocation2 + $0x20] sm:$0xf]  ;;  %v708_v53 = vld [vmem:[#allocation2 + $0x24] sm:$0xf0] }
  0x10   :  { %v656_v51 = vor.u32 %v709_v48, %v653_v50  ;;  %v707_v54 = vld [vmem:[#allocation2 + $0x24] sm:$0xf]  ;;  %v644_v55 = vor.u32 %v708_v53, %v643_v52  ;;  %v645_v56 = vld [vmem:[#allocation2 + $0x28] sm:$0xf0]  ;;  %v635_v58 = vld [vmem:[#allocation2 + $0x10] sm:$0xf] }
  0x11   :  { %398 = vmatpush.bf16.msrb.mxu1 %v680_v27  ;;  %v648_v57 = vor.u32 %v707_v54, %v645_v56  ;;  %v706_v59 = vld [vmem:[#allocation2 + $0x14] sm:$0xf0]  ;;  %v705_v60 = vld [vmem:[#allocation2 + $0x14] sm:$0xf]  ;;  %v637_v62 = vld [vmem:[#allocation2 + $0x18] sm:$0xf0] }
  0x12   :  { %123 = vmatpush.bf16.msra.mxu0 %v697_v3  ;;  %v636_v61 = vor.u32 %v706_v59, %v635_v58  ;;  %v640_v63 = vor.u32 %v705_v60, %v637_v62  ;;  %v704_v1 = vld [vmem:[#allocation2 + $0x4] sm:$0xf0] }
  0x13   :  { %369 = vmatpush.bf16.msrb.mxu3 %v676_v26 }
  0x15   :  { %605 = vmatmul.msk.bf16.vlgmr.msra.gmra.mxu0 %vm103_vm0, %v845_v4  ;;  %399 = vmatpush.bf16.msrb.mxu1 %v672_v34 }
  0x16   :  { %179 = vmatpush.bf16.msrb.mxu0 %v702_v6  ;;  %v629_v6 = vld [vmem:[#allocation2 + $0x8] sm:$0xf0] }
  0x17   :  { %370 = vmatpush.bf16.msrb.mxu3 %v668_v33 }
  0x19   :  { %400 = vmatpush.bf16.msrb.mxu1 %v664_v41 }
  0x1b   :  { %371 = vmatpush.bf16.msrb.mxu3 %v660_v39 }
  0x1d   :  { %622 = vmatmul.msk.bf16.gmra.mxu2 %vm159_vm1, %v698_v2  ;;  %401 = vmatpush.bf16.msrb.mxu1 %v656_v51  ;;  %v703_v2 = vld [vmem:[#allocation2 + $0x4] sm:$0xf] }
  0x1e   :  { %624 = vmatmul.msk.bf16.gmra.mxu3 %vm159_vm1, %v700_v0  ;;  %v627_v0 = vld [vmem:[#allocation2] sm:$0xf]  ;;  %v632_v7 = vor.u32 %v703_v2, %v629_v6 }
  0x1f   :  { %372 = vmatpush.bf16.msrb.mxu3 %v652_v49  ;;  %v628_v3 = vor.u32 %v704_v1, %v627_v0 }
  0x21   :  { %402 = vmatpush.bf16.msrb.mxu1 %v648_v57 }
  0x23   :  { %373 = vmatpush.bf16.msrb.mxu3 %v644_v55 }
  0x25   :  { %606 = vmatmul.msk.bf16.gmra.mxu0 %vm103_vm0, %v852_v5  ;;  %403 = vmatpush.bf16.msrb.mxu1 %v640_v63 }
  0x27   :  { %374 = vmatpush.bf16.msrb.mxu3 %v636_v61 }
  0x29   :  { %404 = vmatpush.bf16.msrb.mxu1 %v632_v7  ;;  %v725_v7 = vld [vmem:[%s936_s6] ss:$0 sm:$0xff] }
  0x2b   :  { %375 = vmatpush.bf16.msrb.mxu3 %v628_v3 }
  0x35   :  { %607 = vmatmul.msk.bf16.gmra.mxu0 %vm103_vm0, %v867_v8 }
  0x45   :  { %608 = vmatmul.msk.bf16.gmra.mxu0 %vm103_vm0, %v876_v9 }
  0x91   :  { %v238_v29 = vpop.f32.mrf.mxu3 }
  0x92   :  { %v125_v10 = vpop.f32.mrf.mxu0 }
  0x99   :  { %v240_v35 = vpop.f32.mrf.mxu3 }
  0x9a   :  { %v127_v11 = vpop.f32.mrf.mxu0 }
  0x9b   :  { %v147_v12 = vpack.c.bf16 %v127_v11, %v125_v10  ;;  %v228_v10 = vpop.f32.mrf.mxu2 }
  0x9d   :  { %613 = vmatmul.msk.bf16.vlgmr.msrb.gmra.mxu0 %vm159_vm1, %v147_v12 }
  0xa2   :  { %v130_v13 = vpop.f32.mrf.mxu0 }
  0xa3   :  { %v230_v12 = vpop.f32.mrf.mxu2 }
  0xaa   :  { %v132_v14 = vpop.f32.mrf.mxu0 }
  0xab   :  { %v148_v15 = vpack.c.bf16 %v132_v14, %v130_v13  ;;  %v724_v14 = vld [vmem:[%s934_s4] ss:$0 sm:$0xff]  ;;  %v233_v21 = vpop.f32.mrf.mxu2 }
  0xad   :  { %614 = vmatmul.msk.bf16.gmra.mxu0 %vm159_vm1, %v148_v15 }
  0xb2   :  { %v135_v30 = vpop.f32.mrf.mxu0 }
  0xb3   :  { %v235_v25 = vpop.f32.mrf.mxu2 }
  0xba   :  { %v137_v40 = vpop.f32.mrf.mxu0 }
  0xbb   :  { %v149_v42 = vpack.c.bf16 %v137_v40, %v135_v30 }
  0xbd   :  { %615 = vmatmul.msk.bf16.vlgmr.msra.gmra.mxu1 %vm159_vm1, %v149_v42 }
  0xc2   :  { %v140_v43 = vpop.f32.mrf.mxu0 }
  0xca   :  { %v142_v44 = vpop.f32.mrf.mxu0 }
  0xcb   :  { %v150_v45 = vpack.c.bf16 %v142_v44, %v140_v43  ;;  %v243_v43 = vpop.f32.mrf.mxu3 }
  0xcd   :  { %616 = vmatmul.msk.bf16.gmra.mxu1 %vm159_vm1, %v150_v45 }
  0xd3   :  { %v245_v47 = vpop.f32.mrf.mxu3 }
 0x11a   :  { %v181_v11 = vpop.f32.mrf.mxu0 }
 0x11b   :  { %v229_v13 = vadd.f32 %v228_v10, %v181_v11 }
 0x11d   :  { %v252_v16 = vadd.f32 %v724_v14, %v229_v13 }
 0x11f   :  { %v260_v19 = vmax.f32 %v252_v16, 0.0 }
 0x122   :  { %v183_v15 = vpop.f32.mrf.mxu0 }
 0x123   :  { %v231_v17 = vadd.f32 %v230_v12, %v183_v15 }
 0x125   :  { %v253_v18 = vadd.f32 %v724_v14, %v231_v17 }
 0x127   :  { %v261_v20 = vmax.f32 %v253_v18, 0.0 }
 0x129   :  { %v268_v22 = vpack.c.bf16 %v261_v20, %v260_v19 }
 0x12a   :  { %v186_v23 = vpop.f32.mrf.mxu0 }
 0x12b   :  { %376 = vmatmul.bf16.vlgmr.msrb.gmra.mxu3 %v268_v22  ;;  %405 = vmatmul.bf16.vlgmr.msrb.gmra.mxu1 %v268_v22  ;;  %v234_v24 = vadd.f32 %v233_v21, %v186_v23 }
 0x12d   :  { %v254_v27 = vadd.f32 %v724_v14, %v234_v24 }
 0x12f   :  { %v262_v31 = vmax.f32 %v254_v27, 0.0 }
 0x132   :  { %v188_v26 = vpop.f32.mrf.mxu0 }
 0x133   :  { %v236_v28 = vadd.f32 %v235_v25, %v188_v26 }
 0x135   :  { %v255_v30 = vadd.f32 %v724_v14, %v236_v28 }
 0x137   :  { %v263_v32 = vmax.f32 %v255_v30, 0.0 }
 0x139   :  { %v269_v33 = vpack.c.bf16 %v263_v32, %v262_v31 }
 0x13a   :  { %v191_v34 = vpop.f32.mrf.mxu1 }
 0x13b   :  { %381 = vmatmul.bf16.gmra.mxu3 %v269_v33  ;;  %410 = vmatmul.bf16.gmra.mxu1 %v269_v33  ;;  %v239_v36 = vadd.f32 %v238_v29, %v191_v34 }
 0x13d   :  { %v256_v38 = vadd.f32 %v724_v14, %v239_v36 }
 0x13f   :  { %v264_v41 = vmax.f32 %v256_v38, 0.0 }
 0x142   :  { %v193_v37 = vpop.f32.mrf.mxu1 }
 0x143   :  { %v241_v39 = vadd.f32 %v240_v35, %v193_v37 }
 0x145   :  { %v257_v40 = vadd.f32 %v724_v14, %v241_v39 }
 0x147   :  { %v265_v42 = vmax.f32 %v257_v40, 0.0 }
 0x149   :  { %v270_v44 = vpack.c.bf16 %v265_v42, %v264_v41 }
 0x14a   :  { %v196_v45 = vpop.f32.mrf.mxu1 }
 0x14b   :  { %386 = vmatmul.bf16.gmra.mxu3 %v270_v44  ;;  %415 = vmatmul.bf16.gmra.mxu1 %v270_v44  ;;  %v244_v46 = vadd.f32 %v243_v43, %v196_v45 }
 0x14d   :  { %v258_v49 = vadd.f32 %v724_v14, %v244_v46 }
 0x14f   :  { %v266_v52 = vmax.f32 %v258_v49, 0.0 }
 0x152   :  { %v198_v48 = vpop.f32.mrf.mxu1 }
 0x153   :  { %v246_v50 = vadd.f32 %v245_v47, %v198_v48 }
 0x155   :  { %v259_v51 = vadd.f32 %v724_v14, %v246_v50 }
 0x157   :  { %v267_v53 = vmax.f32 %v259_v51, 0.0 }
 0x159   :  { %v271_v54 = vpack.c.bf16 %v267_v53, %v266_v52 }
 0x15b   :  { %391 = vmatmul.bf16.gmra.mxu3 %v271_v54  ;;  %420 = vmatmul.bf16.gmra.mxu1 %v271_v54 }
 0x1a8   :  { %v406_v55 = vpop.f32.mrf.mxu1 }
 0x1ae   :  { %v377_v3 = vpop.f32.mrf.mxu3 }
 0x1b0   :  { %v408_v56 = vpop.f32.mrf.mxu1 }
 0x1b1   :  { %v426_v2 = vpack.c.bf16 %v408_v56, %v406_v55 }
 0x1b6   :  { %v379_v6 = vpop.f32.mrf.mxu3 }
 0x1b8   :  { %v411_v57 = vpop.f32.mrf.mxu1 }
 0x1c0   :  { %v413_v58 = vpop.f32.mrf.mxu1 }
 0x1c1   :  { %v427_v1 = vpack.c.bf16 %v413_v58, %v411_v57 }
 0x1c8   :  { %v416_v59 = vpop.f32.mrf.mxu1 }
 0x1d0   :  { %v418_v60 = vpop.f32.mrf.mxu1 }
 0x1d1   :  { %v428_v0 = vpack.c.bf16 %v418_v60, %v416_v59 }
 0x1d8   :  { %v421_v61 = vpop.f32.mrf.mxu1 }
 0x1e0   :  { %v423_v62 = vpop.f32.mrf.mxu1 }
 0x1e1   :  { %v429_v63 = vpack.c.bf16 %v423_v62, %v421_v61 }
 0x1e3   :  { %434 = vmatpush.bf16.msrb.mxu2 %v429_v63 }
 0x1e7   :  { %435 = vmatpush.bf16.msrb.mxu2 %v428_v0 }
 0x1eb   :  { %436 = vmatpush.bf16.msrb.mxu2 %v427_v1 }
 0x1ef   :  { %437 = vmatpush.bf16.msrb.mxu2 %v426_v2 }
 0x1f2   :  { %689 = vmatmul.msk.bf16.vlgmr.msrb.gmra.mxu2 %vm103_vm0, %v845_v4  ;;  %v382_v4 = vpop.f32.mrf.mxu3 }
 0x1fa   :  { %v384_v15 = vpop.f32.mrf.mxu3 }
 0x202   :  { %690 = vmatmul.msk.bf16.gmra.mxu2 %vm103_vm0, %v852_v5  ;;  %v387_v19 = vpop.f32.mrf.mxu3 }
 0x20a   :  { %v389_v24 = vpop.f32.mrf.mxu3 }
 0x212   :  { %691 = vmatmul.msk.bf16.gmra.mxu2 %vm103_vm0, %v867_v8  ;;  %v392_v28 = vpop.f32.mrf.mxu3 }
 0x21a   :  { %v394_v32 = vpop.f32.mrf.mxu3 }
 0x222   :  { %692 = vmatmul.msk.bf16.gmra.mxu2 %vm103_vm0, %v876_v9 }
 0x275   :  { %v439_v10 = vpop.f32.mrf.mxu2 }
 0x276   :  { %v459_v11 = vadd.f32 %v439_v10, %v377_v3 }
 0x278   :  { %v471_v12 = vadd.f32 %v725_v7, %v459_v11 }
 0x27a   :  { %479 = vmax.xlane.f32.xlu0 %v471_v12 }
 0x27d   :  { %v441_v13 = vpop.f32.mrf.mxu2 }
 0x27e   :  { %v460_v14 = vadd.f32 %v441_v13, %v379_v6 }
 0x280   :  { %v472_v5 = vadd.f32 %v725_v7, %v460_v14 }
 0x282   :  { %481 = vmax.xlane.f32.xlu0 %v472_v5 }
 0x285   :  { %v444_v8 = vpop.f32.mrf.mxu2 }
 0x286   :  { %v461_v16 = vadd.f32 %v444_v8, %v382_v4 }
 0x288   :  { %v473_v17 = vadd.f32 %v725_v7, %v461_v16 }
 0x28a   :  { %483 = vmax.xlane.f32.xlu1 %v473_v17 }
 0x28d   :  { %v446_v9 = vpop.f32.mrf.mxu2 }
 0x28e   :  { %v462_v18 = vadd.f32 %v446_v9, %v384_v15 }
 0x290   :  { %v474_v20 = vadd.f32 %v725_v7, %v462_v18 }
 0x292   :  { %485 = vmax.xlane.f32.xlu1 %v474_v20 }
 0x295   :  { %v449_v21 = vpop.f32.mrf.mxu2 }
 0x296   :  { %v463_v22 = vadd.f32 %v449_v21, %v387_v19 }
 0x298   :  { %v475_v23 = vadd.f32 %v725_v7, %v463_v22 }
 0x29a   :  { %487 = vmax.xlane.f32.xlu2 %v475_v23 }
 0x29d   :  { %v451_v25 = vpop.f32.mrf.mxu2 }
 0x29e   :  { %v464_v26 = vadd.f32 %v451_v25, %v389_v24 }
 0x2a0   :  { %v476_v27 = vadd.f32 %v725_v7, %v464_v26 }
 0x2a2   :  { %489 = vmax.xlane.f32.xlu2 %v476_v27 }
 0x2a5   :  { %v454_v29 = vpop.f32.mrf.mxu2 }
 0x2a6   :  { %v465_v30 = vadd.f32 %v454_v29, %v392_v28 }
 0x2a8   :  { %v477_v31 = vadd.f32 %v725_v7, %v465_v30 }
 0x2aa   :  { %491 = vmax.xlane.f32.xlu0 %v477_v31 }
 0x2ad   :  { %v456_v33 = vpop.f32.mrf.mxu2 }
 0x2ae   :  { %v466_v34 = vadd.f32 %v456_v33, %v394_v32 }
 0x2b0   :  { %v478_v35 = vadd.f32 %v725_v7, %v466_v34 }
 0x2b2   :  { %493 = vmax.xlane.f32.xlu1 %v478_v35 }
 0x2ed   :  { %v480_v36 = vpop.xlane.xlu0 %479 }
 0x2ee   :  { %v495_v37 = vsub.f32 %v471_v12, %v480_v36 }
 0x2f0   :  { %v503_v38 = vmul.f32 1.442695, %v495_v37 }
 0x2f2   :  { %726 = vpow2.f32 %v503_v38 }
 0x2f5   :  { %v482_v39 = vpop.xlane.xlu0 %481 }
 0x2f6   :  { %v496_v40 = vsub.f32 %v472_v5, %v482_v39 }
 0x2f8   :  { %v727_v41 = vpop.eup %726  ;;  %v505_v42 = vmul.f32 1.442695, %v496_v40 }
 0x2f9   :  { %519 = vadd.xlane.f32.xlu2 %v727_v41 }
 0x2fa   :  { %728 = vpow2.f32 %v505_v42 }
 0x2fd   :  { %v484_v43 = vpop.xlane.xlu1 %483 }
 0x2fe   :  { %v497_v44 = vsub.f32 %v473_v17, %v484_v43 }
 0x300   :  { %v729_v45 = vpop.eup %728  ;;  %v507_v46 = vmul.f32 1.442695, %v497_v44 }
 0x301   :  { %521 = vadd.xlane.f32.xlu0 %v729_v45 }
 0x302   :  { %730 = vpow2.f32 %v507_v46 }
 0x305   :  { %v486_v47 = vpop.xlane.xlu1 %485 }
 0x306   :  { %v498_v48 = vsub.f32 %v474_v20, %v486_v47 }
 0x308   :  { %v731_v49 = vpop.eup %730  ;;  %v509_v50 = vmul.f32 1.442695, %v498_v48 }
 0x309   :  { %523 = vadd.xlane.f32.xlu1 %v731_v49 }
 0x30a   :  { %732 = vpow2.f32 %v509_v50 }
 0x30d   :  { %v488_v51 = vpop.xlane.xlu2 %487 }
 0x30e   :  { %v499_v52 = vsub.f32 %v475_v23, %v488_v51 }
 0x310   :  { %v733_v53 = vpop.eup %732  ;;  %v511_v54 = vmul.f32 1.442695, %v499_v52 }
 0x311   :  { %525 = vadd.xlane.f32.xlu2 %v733_v53 }
 0x312   :  { %734 = vpow2.f32 %v511_v54 }
 0x315   :  { %v490_v55 = vpop.xlane.xlu2 %489 }
 0x316   :  { %v500_v56 = vsub.f32 %v476_v27, %v490_v55 }
 0x318   :  { %v735_v57 = vpop.eup %734  ;;  %v513_v58 = vmul.f32 1.442695, %v500_v56 }
 0x319   :  { %527 = vadd.xlane.f32.xlu0 %v735_v57 }
 0x31a   :  { %736 = vpow2.f32 %v513_v58 }
 0x31d   :  { %v492_v59 = vpop.xlane.xlu0 %491 }
 0x31e   :  { %v501_v60 = vsub.f32 %v477_v31, %v492_v59 }
 0x320   :  { %v737_v61 = vpop.eup %736  ;;  %v515_v62 = vmul.f32 1.442695, %v501_v60 }
 0x321   :  { %529 = vadd.xlane.f32.xlu1 %v737_v61 }
 0x322   :  { %738 = vpow2.f32 %v515_v62 }
 0x325   :  { %v494_v63 = vpop.xlane.xlu1 %493 }
 0x326   :  { %v502_v0 = vsub.f32 %v478_v35, %v494_v63 }
 0x328   :  { %v739_v1 = vpop.eup %738  ;;  %v517_v2 = vmul.f32 1.442695, %v502_v0 }
 0x329   :  { %531 = vadd.xlane.f32.xlu2 %v739_v1 }
 0x32a   :  { %740 = vpow2.f32 %v517_v2 }
 0x330   :  { %v741_v3 = vpop.eup %740 }
 0x331   :  { %533 = vadd.xlane.f32.xlu0 %v741_v3 }
 0x36c   :  { %v520_v6 = vpop.xlane.xlu2 %519 }
 0x36d   :  { %742 = vlog2.f32 %v520_v6 }
 0x373   :  { %v743_v7 = vpop.eup %742 }
 0x374   :  { %v536_v10 = vmul.f32 0.6931472, %v743_v7  ;;  %v522_v11 = vpop.xlane.xlu0 %521 }
 0x375   :  { %744 = vlog2.f32 %v522_v11 }
 0x376   :  { %v551_v12 = vsub.f32 %v495_v37, %v536_v10 }
 0x378   :  { %560 = vst.msk [vmem:[%s937_s7] sm:$0xff] %vm559_vm2, %v551_v12 }
 0x37b   :  { %v745_v4 = vpop.eup %744 }
 0x37c   :  { %v538_v13 = vmul.f32 0.6931472, %v745_v4  ;;  %v524_v14 = vpop.xlane.xlu1 %523 }
 0x37d   :  { %746 = vlog2.f32 %v524_v14 }
 0x37e   :  { %v552_v5 = vsub.f32 %v496_v40, %v538_v13 }
 0x380   :  { %561 = vst.msk [vmem:[%s937_s7 + $0x8] sm:$0xff] %vm559_vm2, %v552_v5 }
 0x383   :  { %v747_v15 = vpop.eup %746 }
 0x384   :  { %v540_v8 = vmul.f32 0.6931472, %v747_v15  ;;  %v526_v16 = vpop.xlane.xlu2 %525 }
 0x385   :  { %748 = vlog2.f32 %v526_v16 }
 0x386   :  { %v553_v17 = vsub.f32 %v497_v44, %v540_v8 }
 0x388   :  { %562 = vst.msk [vmem:[%s937_s7 + $0x10] sm:$0xff] %vm559_vm2, %v553_v17 }
 0x38b   :  { %v749_v9 = vpop.eup %748 }
 0x38c   :  { %v542_v18 = vmul.f32 0.6931472, %v749_v9  ;;  %v528_v19 = vpop.xlane.xlu0 %527 }
 0x38d   :  { %750 = vlog2.f32 %v528_v19 }
 0x38e   :  { %v554_v20 = vsub.f32 %v498_v48, %v542_v18 }
 0x390   :  { %563 = vst.msk [vmem:[%s937_s7 + $0x18] sm:$0xff] %vm559_vm2, %v554_v20 }
 0x393   :  { %v751_v21 = vpop.eup %750 }
 0x394   :  { %v544_v22 = vmul.f32 0.6931472, %v751_v21  ;;  %v530_v23 = vpop.xlane.xlu1 %529 }
 0x395   :  { %752 = vlog2.f32 %v530_v23 }
 0x396   :  { %v555_v24 = vsub.f32 %v499_v52, %v544_v22 }
 0x398   :  { %564 = vst.msk [vmem:[%s937_s7 + $0x20] sm:$0xff] %vm559_vm2, %v555_v24 }
 0x39b   :  { %v753_v25 = vpop.eup %752 }
 0x39c   :  { %v546_v26 = vmul.f32 0.6931472, %v753_v25  ;;  %v532_v27 = vpop.xlane.xlu2 %531 }
 0x39d   :  { %754 = vlog2.f32 %v532_v27 }
 0x39e   :  { %v556_v28 = vsub.f32 %v500_v56, %v546_v26 }
 0x3a0   :  { %565 = vst.msk [vmem:[%s937_s7 + $0x28] sm:$0xff] %vm559_vm2, %v556_v28 }
 0x3a3   :  { %v755_v29 = vpop.eup %754 }
 0x3a4   :  { %v548_v30 = vmul.f32 0.6931472, %v755_v29  ;;  %v534_v31 = vpop.xlane.xlu0 %533 }
 0x3a5   :  { %756 = vlog2.f32 %v534_v31 }
 0x3a6   :  { %v557_v32 = vsub.f32 %v501_v60, %v548_v30 }
 0x3a8   :  { %566 = vst.msk [vmem:[%s937_s7 + $0x30] sm:$0xff] %vm559_vm2, %v557_v32 }
 0x3ab   :  { %v757_v33 = vpop.eup %756 }
 0x3ac   :  { %v550_v34 = vmul.f32 0.6931472, %v757_v33 }
 0x3ae   :  { %v558_v35 = vsub.f32 %v502_v0, %v550_v34 }
 0x3b0   :  { %567 = vst.msk [vmem:[%s937_s7 + $0x38] sm:$0xff] %vm559_vm2, %v558_v35 }
 0x3b1   :  { %572 = vsyncpa [#allocation3], 1 }

</bundles_post_ra>
